<compile_context>
chip_gen: v5e
topology: v5e:2x2
jax: 0.10.0
libtpu: 0.0.40
codegen_flags: <defaults>
</compile_context>

<pallas_src>
import jax
import jax.numpy as jnp
from jax.experimental import pallas as pl
from jax.experimental.pallas import tpu as pltpu

_LANES = 128
_TARGET_BLOCK_BYTES = 4 * 1024 * 1024   # ~4 MiB per pipelined buffer
_VMEM_LIMIT_BYTES = 32 * 1024 * 1024    # 2 bufs x (in + out) x 4 MiB = 16 MiB, 2x headroom


def _h_sigmoid_kernel(x_ref, o_ref):
    x = x_ref[...]
    # relu6(x + 3) / 6  == clamp(x + 3, 0, 6) * (1/6)
    o_ref[...] = (jnp.clip(x + 3.0, 0.0, 6.0) * (1.0 / 6.0)).astype(o_ref.dtype)


def _round_up(a: int, b: int) -> int:
    return -(-a // b) * b


def _h_sigmoid_2d(x2d: jax.Array) -> jax.Array:
    """Apply the kernel to a (rows, 128) slab (rows need not be tile-aligned)."""
    n_rows, n_cols = x2d.shape
    itemsize = jnp.dtype(x2d.dtype).itemsize
    # minimum sublane tile: 8 for 4-byte, 16 for 2-byte, 32 for 1-byte dtypes
    sublane = max(8, 32 // itemsize)

    # Rows per block targeting ~4 MiB per buffer.
    target_rows = max(sublane,
                      (_TARGET_BLOCK_BYTES // (n_cols * itemsize)) // sublane * sublane)

    if n_rows >= 2 * sublane:
        # Prefer at least 2 grid steps (lets v7x megacore shard the parallel axis)
        # while never exceeding the ~4 MiB target block.
        half_rows = _round_up(-(-n_rows // 2), sublane)
        tile_rows = min(target_rows, half_rows)
    else:
        tile_rows = min(target_rows, _round_up(n_rows, sublane))

    grid = (pl.cdiv(n_rows, tile_rows),)   # final partial block is masked by Pallas

    return pl.pallas_call(
        _h_sigmoid_kernel,
        out_shape=jax.ShapeDtypeStruct((n_rows, n_cols), x2d.dtype),
        grid_spec=pltpu.PrefetchScalarGridSpec(
            num_scalar_prefetch=0,
            grid=grid,
            in_specs=[pl.BlockSpec((tile_rows, n_cols), lambda i: (i, 0))],
            out_specs=pl.BlockSpec((tile_rows, n_cols), lambda i: (i, 0)),
        ),
        compiler_params=pltpu.CompilerParams(
            dimension_semantics=("parallel",),
            vmem_limit_bytes=_VMEM_LIMIT_BYTES,
        ),
    )(x2d)


def h_sigmoid(x: jax.Array) -> jax.Array:
    """y = relu6(x + 3) / 6 elementwise; accepts any shape (NCHW expected)."""
    orig_shape = x.shape
    n_elem = x.size
    flat = x.reshape(-1)

    n_main = (n_elem // _LANES) * _LANES
    if n_main == 0:
        # Tensor smaller than one lane width: trivial, do it in plain JAX.
        return (jnp.clip(x + 3.0, 0.0, 6.0) / 6.0).astype(x.dtype)

    main = _h_sigmoid_2d(flat[:n_main].reshape(n_main // _LANES, _LANES)).reshape(-1)
    if n_main == n_elem:
        return main.reshape(orig_shape)

    # Sub-128-element tail: tiny plain-JAX op instead of whole-tensor pad copies.
    tail = flat[n_main:]
    tail = (jnp.clip(tail + 3.0, 0.0, 6.0) / 6.0).astype(x.dtype)
    return jnp.concatenate([main, tail]).reshape(orig_shape)


if __name__ == "__main__":
    key = jax.random.PRNGKey(0)

    # small NCHW input consistent with the module's typical usage
    x = jax.random.normal(key, (2, 4, 16, 16), dtype=jnp.float32) * 4.0
    y = jax.block_until_ready(h_sigmoid(x))
    y_ref = jnp.clip(x + 3.0, 0.0, 6.0) / 6.0
    assert y.shape == x.shape and y.dtype == x.dtype
    assert jnp.max(jnp.abs(y - y_ref)) < 1e-6

    # shape whose element count is not a multiple of 128 (exercises tail path)
    x2 = jax.random.normal(jax.random.PRNGKey(1), (2, 3, 7, 5), dtype=jnp.float32) * 4.0
    y2 = jax.block_until_ready(h_sigmoid(x2))
    y2_ref = jnp.clip(x2 + 3.0, 0.0, 6.0) / 6.0
    assert y2.shape == x2.shape and y2.dtype == x2.dtype
    assert jnp.max(jnp.abs(y2 - y2_ref)) < 1e-6

    print("KERNEL_OK")
</pallas_src>

<mosaic_0001>
module attributes {stable_mosaic.version = 11 : i64} {
  func.func @_h_sigmoid_kernel(%arg0: i32, %arg1: memref<8x128xf32, #tpu.memory_space<vmem>>, %arg2: memref<8x128xf32, #tpu.memory_space<vmem>>) attributes {dimension_semantics = [#tpu.dimension_semantics<parallel>], iteration_bounds = array<i64: 2>, scalar_prefetch = 0 : i64, scratch_operands = 0 : i64, tpu.core_type = #tpu.core_type<tc>, window_params = [{transform_indices = @transform_0, window_bounds = array<i64: 8, 128>}, {transform_indices = @transform_1, window_bounds = array<i64: 8, 128>}]} {
    %c0 = arith.constant 0 : index
    %c0_0 = arith.constant 0 : index
    %0 = vector.load %arg1[%c0, %c0_0] : memref<8x128xf32, #tpu.memory_space<vmem>>, vector<8x128xf32>
    %cst = arith.constant 3.000000e+00 : f32
    %1 = vector.broadcast %cst : f32 to vector<8x128xf32>
    %2 = arith.addf %0, %1 : vector<8x128xf32>
    %cst_1 = arith.constant 0.000000e+00 : f32
    %cst_2 = arith.constant 6.000000e+00 : f32
    %3 = vector.broadcast %cst_1 : f32 to vector<8x128xf32>
    %4 = arith.maximumf %3, %2 : vector<8x128xf32>
    %5 = vector.broadcast %cst_2 : f32 to vector<8x128xf32>
    %6 = arith.minimumf %5, %4 : vector<8x128xf32>
    %cst_3 = arith.constant 0.166666672 : f32
    %7 = vector.broadcast %cst_3 : f32 to vector<8x128xf32>
    %8 = arith.mulf %6, %7 : vector<8x128xf32>
    %c0_4 = arith.constant 0 : index
    %c0_5 = arith.constant 0 : index
    %9 = vector.load %arg2[%c0_4, %c0_5] : memref<8x128xf32, #tpu.memory_space<vmem>>, vector<8x128xf32>
    tpu.vector_store %arg2[%c0_4, %c0_5], %8 {strides = array<i32>} : memref<8x128xf32, #tpu.memory_space<vmem>>, vector<8x128xf32>,
    return
  }
  func.func @transform_0(%arg0: i32) -> (i32, i32) {
    %c0_i32 = arith.constant 0 : i32
    %c0_i32_0 = arith.constant 0 : i32
    return %arg0, %c0_i32 : i32, i32
  }
  func.func @transform_1(%arg0: i32) -> (i32, i32) {
    %c0_i32 = arith.constant 0 : i32
    %c0_i32_0 = arith.constant 0 : i32
    return %arg0, %c0_i32 : i32, i32
  }
}

</mosaic_0001>

<bundles_post_ra>
// kernel: tpu_custom_call.1
= control target key start
LH: loop header
LB: loop body
LE: loop exit
PB: predicated region body
PF: predicated region fallthrough
CT: control target
= control target key end

     0   :  { %6 = vsyncpa [#allocation3], 0  ;;  %s519_s0 = inlined_call_operand.hbm [shape: f32[16,128], index: 0, kind: input, shape index: {}]   ;;  %s520_s1 = inlined_call_operand.hbm [shape: f32[16,128], index: 1, kind: output, shape index: {}]  }
   0x1   :  { %8 = vsyncpa [#allocation3 + $0x1], 0 }
   0x2   :  { %9 = vsyncpa [#allocation4], 0 }
   0x3   :  { %11 = vsyncpa [#allocation4 + $0x1], 0  ;;  %s392_s6 = smov 0   ;;  %s394_s7 = smov 0  }
   0x4   :  { %s396_s8 = smov 0   ;;  %s398_s9 = smov 0  }
   0x5 LB: > { %s413_s10 = sadd.s32 4294967295, %s380_s9   ;;  %s226_s11 = sadd.s32 4294967294, %s380_s9   ;;  %s380_s9 = sphi %s398_s9, %s530_s9   ;;  %s376_s8 = sphi %s396_s8, %s529_s8   ;;  %s372_s7 = sphi %s394_s7, %s528_s7   ;;  %s368_s6 = sphi %s392_s6, %s527_s6  }
   0x6   : > { %s417_s12 = sadd.s32 1, %s380_s9   ;;  %s24_s13 = sadd.s32 1, %s376_s8 }
   0x7   : > { %s21_s14 = ssub.s32 %s380_s9, %s417_s12  ;;  %p31_p0 = scmp.ne.s32.totalorder %s376_s8, %s372_s7 }
   0x8   : > { %p22_p1 = scmp.eq.s32.totalorder %s21_s14, 0  ;;  %p32_p2 = scmp.eq.s32.totalorder %s380_s9, 0 }
   0x9   : > { %p37_p3 = scmp.ne.s32.totalorder %s372_s7, %s368_s6  ;;  %p38_p4 = scmp.eq.s32.totalorder %s413_s10, 0 }
   0xa   : > { %s429_s15 = scalar_select %p22_p1, %s376_s8, %s24_s13  }
   0xb   : > { %p431_p5 = por %p32_p2, %p31_p0  ;;  %p435_p6 = por %p38_p4, %p37_p3 }
   0xc   : > { %p61_p7 = scmp.eq.s32.totalorder %s413_s10, 1  ;;  %p67_p8 = scmp.eq.s32.totalorder %s226_s11, 1 }
   0xd   : > { %p250_p10 = scmp.lt.s32.totalorder %s380_s9, 2  ;;  %s87_s20 = sand.u32 1, %s376_s8  }
   0xe   : > { %p442_p11 = por %p61_p7, %p31_p0  ;;  %p446_p12 = por %p67_p8, %p37_p3 }
   0xf   : > { %s230_s21 = sshll.u32 %s380_s9, 3  ;;  %s229_s22 = sshll.u32 %s87_s20, 3 }
  0x10   : > { %s95_s25 = scalar_lea.hbm %s519_s0, %s230_s21  ;;  %s91_s27 = scalar_lea.vmem [#allocation2], %s229_s22 }
  0x11   : > { %s97_s26 = sshll.u32 %s95_s25, 4  ;;  %s99_s28 = sshll.u32 %s91_s27, 4  ;;  %s98_s26 = int_to_ptr.hbm [resolvable:$true] %s97_s26  ;;  %s100_s28 = int_to_ptr.vmem [resolvable:$true] %s99_s28 }
  0x12   : > { %p457_p13 = pnand %p250_p10, %p431_p5  ;;  %p231_p0 = scmp.ge.s32.totalorder %s380_s9, 1 }
  0x13   : > { %p104_p1 = scmp.lt.s32.totalorder %s380_s9, 3  ;;  %s88_s30 = scalar_lea.sflag [#allocation3], %s87_s20 }
  0x14   : > { %s284_s2 = sshra.s32 %s98_s26, 4  ;;  %p288_p3 = pneg %p457_p13  ;;  %s285_s2 = int_to_ptr.hbm [resolvable:$true] %s284_s2 }
  0x15   : > { %s286_s3 = scalar_lea.hbm %s285_s2, 8  ;;  %s291_s11 = scalar_lea.hbm %s519_s0, 16 }
  0x16   : > { %p287_p2 = scmp.ne.s32.totalorder %s285_s2, %s286_s3  ;;  %p292_p5 = scmp.lt.s32.totalorder %s285_s2, %s519_s0 }
  0x17   : > { %p293_p8 = scmp.lt.s32.totalorder %s291_s11, %s286_s3 }
  0x18   : > { %p289_p4 = pnand %p288_p3, %p287_p2 }
  0x19   : > { %p294_p10 = por %p293_p8, %p292_p5 }
  0x1a   : > { %p290_p7 = pneg %p289_p4 }
  0x1c   : > { %p295_p9 = pnand %p294_p10, %p290_p7 }
  0x1e   : > { %298 = shalt.err (!%p295_p9)
}
  0x1f   : > { %245 = dma.hbm_to_vmem [thread:$0]  (!%p457_p13), %s98_s26, 128, %s100_s28, %s88_s30  }
  0x20   : > { %p105_p2 = pnand %p231_p0, %p104_p1 }
  0x21   : > { %s478_s16 = sand.u32 (!%p105_p2), 1, %s372_s7  }
  0x22   : > { %108 = sbr.rel (%p105_p2) target bundleno = 55 (0x37), region = 24  ;;  %s232_s20 = sshll.u32 (!%p105_p2), %s478_s16, 3 }
  0x23   : > { %s111_s21 = scalar_lea.sflag (!%p105_p2), [#allocation3], %s478_s16  ;;  %s114_s22 = scalar_lea.vmem (!%p105_p2), [#allocation2], %s232_s20 }
  0x27   : > { %359 = dma.done.wait (%p435_p6), %s111_s21, 128  }
  0x28   : > { %361 = vsyncadd (%p435_p6), %s111_s21, 4294967168  ;;  %s235_s23 = sshll.u32 %s413_s10, 3  ;;  %v134_v0 = vld [vmem:[%s114_s22] sm:$0xff]  ;;  %s133_s27 = scalar_lea.vmem [#allocation5], %s232_s20 }
  0x29   : > { %v135_v1 = vadd.f32 3.0, %v134_v0  ;;  %s151_s26 = scalar_lea.hbm %s520_s1, %s235_s23  ;;  %s153_s28 = sshll.u32 %s133_s27, 4  ;;  %s154_s28 = int_to_ptr.vmem [resolvable:$true] %s153_s28 }
  0x2a   : > { %s155_s29 = sshll.u32 %s151_s26, 4  ;;  %s141_s17 = scalar_lea.sflag [#allocation4], %s478_s16  ;;  %s156_s29 = int_to_ptr.hbm [resolvable:$true] %s155_s29 }
  0x2b   : > { %v136_v2 = vmax.f32 %v135_v1, 0.0  ;;  %s328_s30 = sshra.s32 %s156_s29, 4  ;;  %s334_s4 = scalar_lea.hbm %s520_s1, 16  ;;  %s329_s30 = int_to_ptr.hbm [resolvable:$true] %s328_s30 }
  0x2c   : > { %s330_s10 = scalar_lea.hbm %s329_s30, 8  ;;  %p335_p0 = scmp.lt.s32.totalorder %s329_s30, %s520_s1 }
  0x2d   : > { %v137_v3 = vmin.f32 %v136_v2, 6.0  ;;  %p331_p6 = scmp.ne.s32.totalorder %s329_s30, %s330_s10  ;;  %p336_p1 = scmp.lt.s32.totalorder %s334_s4, %s330_s10 }
  0x2f   : > { %v138_v4 = vmul.f32 0.16666667, %v137_v3  ;;  %p332_p9 = pnand %p331_p6, %p442_p11  ;;  %p337_p3 = por %p336_p1, %p335_p0 }
  0x31   : > { %139 = vst [vmem:[%s133_s27] sm:$0xff] %v138_v4  ;;  %p333_p13 = pneg %p332_p9 }
  0x33   : > { %p338_p4 = pnand %p337_p3, %p333_p13 }
  0x35   : > { %341 = shalt.err (!%p338_p4)
}
  0x36   : > { %240 = dma.vmem_to_hbm [thread:$0]  (%p442_p11), %s154_s28, 128, %s156_s29, %s141_s17  }
  0x37 PF: > { %s167_s13 = sand.u32 1, %s368_s6   ;;  %p526_p7 = scmp.ge.s32.totalorder %s380_s9, 2 }
  0x38   : > { %s168_s14 = scalar_lea.sflag [#allocation4], %s167_s13 }
  0x39   : > { %p247_p5 = pnand %p526_p7, %p446_p12 }
  0x3b   : > { %p248_p8 = pneg %p247_p5 }
  0x3d   : > { %363 = dma.done.wait (%p248_p8), %s168_s14, 128  }
  0x3e   : > { %365 = vsyncadd (%p248_p8), %s168_s14, 4294967168  ;;  %p14_p10 = scmp.ge.s32.totalorder %s417_s12, 4   ;;  %s527_s6 = smov %s372_s7 }
  0x3f   : > { %s528_s7 = smov %s376_s8  ;;  %s529_s8 = smov %s429_s15 }
  0x40   : > { %s530_s9 = smov %s417_s12  ;;  %16 = sbr.rel (!%p14_p10) target bundleno = 5 (0x5), region = 69 }
  0x45   :  { %174 = vsyncpa [#allocation3], 1 }
  0x46   :  { %176 = vsyncpa [#allocation3 + $0x1], 1 }
  0x47   :  { %177 = vsyncpa [#allocation4], 1 }
  0x48   :  { %179 = vsyncpa [#allocation4 + $0x1], 1 }

</bundles_post_ra>
